<compile_context>
chip_gen: v6e
topology: v6e:2x2x1
jax: 0.10.0
libtpu: 0.0.40
codegen_flags: <defaults>
</compile_context>

<pallas_src>
import functools

import jax
import jax.numpy as jnp
from jax.experimental import pallas as pl
from jax.experimental.pallas import tpu as pltpu


# ----------------------------------------------------------------------------- kernel

def govern_conv_kernel(feat_ref, sdst_ref, ssrct_ref, ebias_ref, out_ref, *, heads, d_out):
    """One GOVERNConv layer. Grid axis 0 = tile of destination nodes (parallel).

    feat_ref  [N, H*D]   bf16  hoisted node transform (whole-array VMEM resident)
    sdst_ref  [TILE, H]        destination attention scores (compute dtype, per tile)
    ssrct_ref [H, N]           source attention scores (compute dtype, VMEM resident)
    ebias_ref [H, TILE, N] bf16 edge bias with adjacency mask folded in (-1e30 = non-edge)
    out_ref   [TILE, D]  f32
    """
    feat = feat_ref[...]                                      # [N, H*D] bf16
    sdst = sdst_ref[...]                                      # [TILE, H]
    ssrct = ssrct_ref[...]                                    # [H, N]
    cdt = sdst.dtype                                          # bf16 (v6e/v7x) or f32 (v5e)

    tile_n = out_ref.shape[0]
    out_sum = jnp.zeros((tile_n, d_out), jnp.float32)

    for h in range(heads):                                    # short static loop (H ~ 4)
        # Logit assembly + LeakyReLU(0.2) in the chip-appropriate compute dtype.
        logits = sdst[:, h:h + 1] + ssrct[h:h + 1, :] + ebias_ref[h].astype(cdt)  # [TILE, N]
        logits = jnp.where(logits > 0, logits, logits * 0.2)

        # Row-wise softmax statistics in f32; masked entries underflow to exactly 0.
        logits32 = logits.astype(jnp.float32)
        m = jnp.max(logits32, axis=-1, keepdims=True)
        p = jnp.exp(logits32 - m)                             # [TILE, N] unnormalized
        denom = jnp.sum(p, axis=-1, keepdims=True)            # >= 1 (row max contributes 1)

        # Aggregate with UNNORMALIZED weights (bf16 MXU operands, f32 accumulation),
        # then post-scale the tiny [TILE, D] result (deferred normalization).
        agg = jnp.dot(p.astype(jnp.bfloat16), feat[:, h * d_out:(h + 1) * d_out],
                      preferred_element_type=jnp.float32)     # [TILE, D]
        out_sum = out_sum + agg * pl.reciprocal(denom, approx=True)

    mean = out_sum * jnp.float32(1.0 / heads)                 # head average
    out_ref[...] = jnp.where(mean > 0, mean,
                             jnp.exp(jnp.minimum(mean, 0.0)) - 1.0)   # ELU


def govern_conv(feat_bf, sdst, ssrct, ebias, *, heads, d_out, tile_n, vmem_limit):
    """Pallas wrapper for one GOVERNConv layer (grid over destination-node tiles)."""
    n, hd = feat_bf.shape
    num_tiles = n // tile_n
    kernel = functools.partial(govern_conv_kernel, heads=heads, d_out=d_out)
    return pl.pallas_call(
        kernel,
        out_shape=jax.ShapeDtypeStruct((n, d_out), jnp.float32),
        grid=(num_tiles,),
        in_specs=[
            # Grid-invariant inputs: whole-array VMEM residency (no per-step pipelining).
            pl.BlockSpec(memory_space=pltpu.MemorySpace.VMEM),        # feat_bf [N, H*D]
            pl.BlockSpec((tile_n, heads), lambda t: (t, 0)),          # dst scores per tile
            pl.BlockSpec(memory_space=pltpu.MemorySpace.VMEM),        # ssrct [H, N]
            pl.BlockSpec((heads, tile_n, n), lambda t: (0, t, 0)),    # masked ebias (bf16)
        ],
        out_specs=pl.BlockSpec((tile_n, d_out), lambda t: (t, 0)),
        compiler_params=pltpu.CompilerParams(
            dimension_semantics=("parallel",),       # dst tiles shard across v7x's 2 TCs
            vmem_limit_bytes=vmem_limit,
        ),
    )(feat_bf, sdst, ssrct, ebias)


# ----------------------------------------------------------------------------- host glue

def _tpu_generation():
    """Best-effort TPU generation from the device kind string (host side, trace time)."""
    try:
        kind = jax.devices()[0].device_kind.lower()
    except Exception:
        return 5
    for g in (7, 6, 5, 4, 3, 2):
        if f"v{g}" in kind:
            return g
    return 5


def _hw_config():
    """Generation-aware compute dtype, ebias double-buffer budget and VMEM limit."""
    gen = _tpu_generation()
    if gen >= 7:   # v7x: 64 MiB VMEM/TC -> tight limit and smaller streamed-tile budget.
        return dict(compute_dtype=jnp.bfloat16,
                    ebias_budget=18 * 1024 * 1024,
                    vmem_limit=40 * 1024 * 1024)
    if gen == 6:   # v6e: 128 MiB VMEM, bf16 VALU/EUP -> big tiles, bf16 logits math.
        return dict(compute_dtype=jnp.bfloat16,
                    ebias_budget=40 * 1024 * 1024,
                    vmem_limit=100 * 1024 * 1024)
    # v5e and older: 128 MiB VMEM but no bf16 VALU/EUP -> keep logits math in f32.
    return dict(compute_dtype=jnp.float32,
                ebias_budget=40 * 1024 * 1024,
                vmem_limit=100 * 1024 * 1024)


def pick_tile_n(n, heads, budget_bytes):
    """Largest dst tile that divides N, is a multiple of 16 (bf16 sublane tile), and keeps
    the double-buffered bf16 ebias tile under the per-generation VMEM budget."""
    for t in (512, 256, 128, 64, 32, 16):
        if n % t == 0 and heads * t * n * 2 * 2 <= budget_bytes:
            return t
    # Small / irregular N: single full-extent tile.
    # TODO(synk): large N with no suitable divisor falls back to a full-N tile; a
    #             source-node grid axis with online softmax would be needed there.
    return n


def build_neg_template(edge_index, num_nodes, heads):
    """bf16 [H, N, N] template: 0 on edges/self-loops, -1e30 elsewhere. Built ONCE."""
    src, dst = edge_index[0], edge_index[1]
    mask = jnp.zeros((num_nodes, num_nodes), jnp.bool_)
    mask = mask.at[dst, src].set(True)
    idx = jnp.arange(num_nodes)
    mask = mask.at[idx, idx].set(True)
    tmpl = jnp.where(mask, 0.0, -1e30).astype(jnp.bfloat16)
    return jnp.broadcast_to(tmpl[None], (heads, num_nodes, num_nodes))


def layer_edge_bias(template_bf, edge_index, edge_attr, w_edge, a_edge):
    """Scatter this layer's per-head edge scores into the prebuilt masked template.
    .add keeps accumulation semantics for duplicate edges; -1e30 sentinels stay -1e30."""
    src, dst = edge_index[0], edge_index[1]
    e_feat = jnp.einsum('ef,hfd->hed', edge_attr, w_edge)     # [H, E, D]
    e_score = jnp.einsum('hed,hd->he', e_feat, a_edge)        # [H, E]
    return template_bf.at[:, dst, src].add(e_score.astype(jnp.bfloat16))


def fuse_layer_params(layer):
    """Per-head (W, b, a_src, a_dst) -> lane-dense fused weights and score projections."""
    w, b = layer['w'], layer['b']                             # [H, Cin, D], [H, 1, D]
    a_src, a_dst = layer['a_src'], layer['a_dst']             # [H, 1, D]
    heads, c_in, d = w.shape
    w_all = jnp.transpose(w, (1, 0, 2)).reshape(c_in, heads * d)     # [Cin, H*D]
    b_all = b.reshape(1, heads * d)                                  # [1, H*D]
    # Fold a_dst / a_src into the node transform: score_h(x) = x @ (W_h a_h) + b_h . a_h
    w_sdst = jnp.einsum('hcd,hd->ch', w, a_dst[:, 0, :])             # [Cin, H]
    b_sdst = jnp.einsum('hd,hd->h', b[:, 0, :], a_dst[:, 0, :])[None, :]
    w_ssrc = jnp.einsum('hcd,hd->ch', w, a_src[:, 0, :])
    b_ssrc = jnp.einsum('hd,hd->h', b[:, 0, :], a_src[:, 0, :])[None, :]
    return w_all, b_all, w_sdst, b_sdst, w_ssrc, b_ssrc


def init_govern_encoder_params(key, num_class, in_channels, out_channels, heads,
                               hiddens, edge_dim):
    """Deterministic parameter init for the whole encoder (shapes per GOVERNConv)."""
    del num_class  # TODO(synk): unused (GOVERNConv definition not provided).
    params = []
    channel = in_channels
    for i in range(hiddens):
        k = jax.random.fold_in(key, i)
        ks = jax.random.split(k, 6)
        s_node = 1.0 / jnp.sqrt(jnp.float32(channel))
        s_edge = 1.0 / jnp.sqrt(jnp.float32(edge_dim))
        s_att = 1.0 / jnp.sqrt(jnp.float32(out_channels))
        params.append({
            'w':      jax.random.normal(ks[0], (heads, channel, out_channels), jnp.float32) * s_node,
            'b':      jnp.zeros((heads, 1, out_channels), jnp.float32),
            'a_src':  jax.random.normal(ks[1], (heads, 1, out_channels), jnp.float32) * s_att,
            'a_dst':  jax.random.normal(ks[2], (heads, 1, out_channels), jnp.float32) * s_att,
            'w_edge': jax.random.normal(ks[3], (heads, edge_dim, out_channels), jnp.float32) * s_edge,
            'a_edge': jax.random.normal(ks[4], (heads, out_channels), jnp.float32) * s_att,
        })
        channel = out_channels
    return params


@functools.partial(jax.jit, static_argnames=('size',))
def govern_encoder_forward(x, size, edge_index, edge_attr, params):
    """Mirrors GOVERNEncoder.forward: sequentially apply each GOVERNConv layer."""
    cfg = _hw_config()
    heads = params[0]['w'].shape[0]
    d_out = params[0]['w'].shape[2]
    cdt = cfg['compute_dtype']
    tile_n = pick_tile_n(size, heads, cfg['ebias_budget'])
    # Masked edge-bias template built once; every layer only scatters its scores into it.
    template_bf = build_neg_template(edge_index, size, heads)
    for layer in params:
        w_all, b_all, w_sdst, b_sdst, w_ssrc, b_ssrc = fuse_layer_params(layer)
        # Hoisted node transform (once per layer, plain XLA) -> bf16 feat for the kernel.
        feat_bf = (x @ w_all + b_all).astype(jnp.bfloat16)          # [N, H*D]
        # Tiny score projections (avoid per-head cross-lane reductions in the kernel).
        sdst = (x @ w_sdst + b_sdst).astype(cdt)                    # [N, H]
        ssrct = (x @ w_ssrc + b_ssrc).T.astype(cdt)                 # [H, N]
        ebias = layer_edge_bias(template_bf, edge_index, edge_attr,
                                layer['w_edge'], layer['a_edge'])   # [H, N, N] bf16
        x = govern_conv(feat_bf, sdst, ssrct, ebias,
                        heads=heads, d_out=d_out, tile_n=tile_n,
                        vmem_limit=cfg['vmem_limit'])
    return x


if __name__ == "__main__":
    # Small deterministic example consistent with the module's forward signature.
    num_class, in_channels, out_channels, heads, hiddens = 3, 8, 32, 4, 2
    N, E, edge_dim = 16, 48, 4

    key = jax.random.PRNGKey(0)
    k_x, k_src, k_dst, k_ea, k_p = jax.random.split(key, 5)

    x = jax.random.normal(k_x, (N, in_channels), jnp.float32)
    edge_index = jnp.stack([
        jax.random.randint(k_src, (E,), 0, N),
        jax.random.randint(k_dst, (E,), 0, N),
    ], axis=0)                                               # [2, E]
    edge_attr = jax.random.normal(k_ea, (E, edge_dim), jnp.float32)

    params = init_govern_encoder_params(k_p, num_class, in_channels, out_channels,
                                        heads, hiddens, edge_dim)

    out = govern_encoder_forward(x, N, edge_index, edge_attr, params)
    out = jax.block_until_ready(out)

    assert out.shape == (N, out_channels)
    assert bool(jnp.all(jnp.isfinite(out)))
    print("KERNEL_OK")
</pallas_src>

<mosaic_0001>
module attributes {stable_mosaic.version = 11 : i64} {
  func.func @govern_conv_kernel(%arg0: i32, %arg1: memref<16x128xbf16, #tpu.memory_space<vmem>>, %arg2: memref<16x4xf32, #tpu.memory_space<vmem>>, %arg3: memref<4x16xf32, #tpu.memory_space<vmem>>, %arg4: memref<4x16x16xbf16, #tpu.memory_space<vmem>>, %arg5: memref<16x32xf32, #tpu.memory_space<vmem>>) attributes {dimension_semantics = [#tpu.dimension_semantics<parallel>], iteration_bounds = array<i64: 1>, scalar_prefetch = 0 : i64, scratch_operands = 0 : i64, tpu.core_type = #tpu.core_type<tc>, window_params = [{pipeline_mode = #tpu.pipeline_mode<synchronous>, transform_indices = @transform_0, window_bounds = array<i64: 16, 128>}, {transform_indices = @transform_1, window_bounds = array<i64: 16, 4>}, {pipeline_mode = #tpu.pipeline_mode<synchronous>, transform_indices = @transform_2, window_bounds = array<i64: 4, 16>}, {transform_indices = @transform_3, window_bounds = array<i64: 4, 16, 16>}, {transform_indices = @transform_4, window_bounds = array<i64: 16, 32>}]} {
    %c0 = arith.constant 0 : index
    %c0_0 = arith.constant 0 : index
    %0 = vector.load %arg1[%c0, %c0_0] : memref<16x128xbf16, #tpu.memory_space<vmem>>, vector<16x128xbf16>
    %c0_1 = arith.constant 0 : index
    %c0_2 = arith.constant 0 : index
    %1 = vector.load %arg2[%c0_1, %c0_2] : memref<16x4xf32, #tpu.memory_space<vmem>>, vector<16x4xf32>
    %c0_3 = arith.constant 0 : index
    %c0_4 = arith.constant 0 : index
    %2 = vector.load %arg3[%c0_3, %c0_4] : memref<4x16xf32, #tpu.memory_space<vmem>>, vector<4x16xf32>
    %cst = arith.constant 0.000000e+00 : f32
    %3 = vector.broadcast %cst : f32 to vector<16x32xf32>
    %4 = vector.extract_strided_slice %1 {offsets = [0, 0], sizes = [16, 1], strides = [1, 1]} : vector<16x4xf32> to vector<16x1xf32>
    %5 = vector.extract_strided_slice %2 {offsets = [0, 0], sizes = [1, 16], strides = [1, 1]} : vector<4x16xf32> to vector<1x16xf32>
    %6 = vector.broadcast %4 : vector<16x1xf32> to vector<16x16xf32>
    %7 = vector.broadcast %5 : vector<1x16xf32> to vector<16x16xf32>
    %8 = arith.addf %6, %7 : vector<16x16xf32>
    %c0_5 = arith.constant 0 : index
    %c0_6 = arith.constant 0 : index
    %c0_7 = arith.constant 0 : index
    %9 = vector.load %arg4[%c0_5, %c0_6, %c0_7] : memref<4x16x16xbf16, #tpu.memory_space<vmem>>, vector<1x16x16xbf16>
    %10 = vector.shape_cast %9 : vector<1x16x16xbf16> to vector<16x16xbf16>
    %11 = arith.extf %10 : vector<16x16xbf16> to vector<16x16xf32>
    %12 = arith.addf %8, %11 : vector<16x16xf32>
    %cst_8 = arith.constant 0.000000e+00 : f32
    %13 = vector.broadcast %cst_8 : f32 to vector<16x16xf32>
    %14 = arith.cmpf ogt, %12, %13 : vector<16x16xf32>
    %cst_9 = arith.constant 2.000000e-01 : f32
    %15 = vector.broadcast %cst_9 : f32 to vector<16x16xf32>
    %16 = arith.mulf %12, %15 : vector<16x16xf32>
    %17 = arith.select %14, %12, %16 : vector<16x16xi1>, vector<16x16xf32>
    %cst_10 = arith.constant dense<0xFF800000> : vector<16xf32>
    %18 = vector.multi_reduction <maximumf>, %17, %cst_10 [1] : vector<16x16xf32> to vector<16xf32>
    %19 = vector.shape_cast %18 : vector<16xf32> to vector<16x1xf32>
    %20 = vector.broadcast %19 : vector<16x1xf32> to vector<16x16xf32>
    %21 = arith.subf %17, %20 : vector<16x16xf32>
    %22 = math.exp %21 : vector<16x16xf32>
    %cst_11 = arith.constant dense<0.000000e+00> : vector<16xf32>
    %23 = vector.multi_reduction <add>, %22, %cst_11 [1] : vector<16x16xf32> to vector<16xf32>
    %24 = vector.shape_cast %23 : vector<16xf32> to vector<16x1xf32>
    %25 = arith.truncf %22 : vector<16x16xf32> to vector<16x16xbf16>
    %26 = vector.extract_strided_slice %0 {offsets = [0, 0], sizes = [16, 32], strides = [1, 1]} : vector<16x128xbf16> to vector<16x32xbf16>
    %cst_12 = arith.constant dense<0.000000e+00> : vector<16x32xf32>
    %27 = tpu.matmul %25, %26, %cst_12 {dimension_numbers = #tpu.dot_dimension_numbers<[1], [0], [0], [1], [0, 0, 1, 1], [], []>} : vector<16x16xbf16>, vector<16x32xbf16>, vector<16x32xf32> -> vector<16x32xf32>
    %28 = tpu.reciprocal %24 {approx = true} : vector<16x1xf32> -> vector<16x1xf32>
    %29 = vector.broadcast %28 : vector<16x1xf32> to vector<16x32xf32>
    %30 = arith.mulf %27, %29 : vector<16x32xf32>
    %31 = arith.addf %3, %30 : vector<16x32xf32>
    %32 = vector.extract_strided_slice %1 {offsets = [0, 1], sizes = [16, 1], strides = [1, 1]} : vector<16x4xf32> to vector<16x1xf32>
    %33 = vector.extract_strided_slice %2 {offsets = [1, 0], sizes = [1, 16], strides = [1, 1]} : vector<4x16xf32> to vector<1x16xf32>
    %34 = vector.broadcast %32 : vector<16x1xf32> to vector<16x16xf32>
    %35 = vector.broadcast %33 : vector<1x16xf32> to vector<16x16xf32>
    %36 = arith.addf %34, %35 : vector<16x16xf32>
    %c1 = arith.constant 1 : index
    %c0_13 = arith.constant 0 : index
    %c0_14 = arith.constant 0 : index
    %37 = vector.load %arg4[%c1, %c0_13, %c0_14] : memref<4x16x16xbf16, #tpu.memory_space<vmem>>, vector<1x16x16xbf16>
    %38 = vector.shape_cast %37 : vector<1x16x16xbf16> to vector<16x16xbf16>
    %39 = arith.extf %38 : vector<16x16xbf16> to vector<16x16xf32>
    %40 = arith.addf %36, %39 : vector<16x16xf32>
    %cst_15 = arith.constant 0.000000e+00 : f32
    %41 = vector.broadcast %cst_15 : f32 to vector<16x16xf32>
    %42 = arith.cmpf ogt, %40, %41 : vector<16x16xf32>
    %cst_16 = arith.constant 2.000000e-01 : f32
    %43 = vector.broadcast %cst_16 : f32 to vector<16x16xf32>
    %44 = arith.mulf %40, %43 : vector<16x16xf32>
    %45 = arith.select %42, %40, %44 : vector<16x16xi1>, vector<16x16xf32>
    %cst_17 = arith.constant dense<0xFF800000> : vector<16xf32>
    %46 = vector.multi_reduction <maximumf>, %45, %cst_17 [1] : vector<16x16xf32> to vector<16xf32>
    %47 = vector.shape_cast %46 : vector<16xf32> to vector<16x1xf32>
    %48 = vector.broadcast %47 : vector<16x1xf32> to vector<16x16xf32>
    %49 = arith.subf %45, %48 : vector<16x16xf32>
    %50 = math.exp %49 : vector<16x16xf32>
    %cst_18 = arith.constant dense<0.000000e+00> : vector<16xf32>
    %51 = vector.multi_reduction <add>, %50, %cst_18 [1] : vector<16x16xf32> to vector<16xf32>
    %52 = vector.shape_cast %51 : vector<16xf32> to vector<16x1xf32>
    %53 = arith.truncf %50 : vector<16x16xf32> to vector<16x16xbf16>
    %54 = vector.extract_strided_slice %0 {offsets = [0, 32], sizes = [16, 32], strides = [1, 1]} : vector<16x128xbf16> to vector<16x32xbf16>
    %cst_19 = arith.constant dense<0.000000e+00> : vector<16x32xf32>
    %55 = tpu.matmul %53, %54, %cst_19 {dimension_numbers = #tpu.dot_dimension_numbers<[1], [0], [0], [1], [0, 0, 1, 1], [], []>} : vector<16x16xbf16>, vector<16x32xbf16>, vector<16x32xf32> -> vector<16x32xf32>
    %56 = tpu.reciprocal %52 {approx = true} : vector<16x1xf32> -> vector<16x1xf32>
    %57 = vector.broadcast %56 : vector<16x1xf32> to vector<16x32xf32>
    %58 = arith.mulf %55, %57 : vector<16x32xf32>
    %59 = arith.addf %31, %58 : vector<16x32xf32>
    %60 = vector.extract_strided_slice %1 {offsets = [0, 2], sizes = [16, 1], strides = [1, 1]} : vector<16x4xf32> to vector<16x1xf32>
    %61 = vector.extract_strided_slice %2 {offsets = [2, 0], sizes = [1, 16], strides = [1, 1]} : vector<4x16xf32> to vector<1x16xf32>
    %62 = vector.broadcast %60 : vector<16x1xf32> to vector<16x16xf32>
    %63 = vector.broadcast %61 : vector<1x16xf32> to vector<16x16xf32>
    %64 = arith.addf %62, %63 : vector<16x16xf32>
    %c2 = arith.constant 2 : index
    %c0_20 = arith.constant 0 : index
    %c0_21 = arith.constant 0 : index
    %65 = vector.load %arg4[%c2, %c0_20, %c0_21] : memref<4x16x16xbf16, #tpu.memory_space<vmem>>, vector<1x16x16xbf16>
    %66 = vector.shape_cast %65 : vector<1x16x16xbf16> to vector<16x16xbf16>
    %67 = arith.extf %66 : vector<16x16xbf16> to vector<16x16xf32>
    %68 = arith.addf %64, %67 : vector<16x16xf32>
    %cst_22 = arith.constant 0.000000e+00 : f32
    %69 = vector.broadcast %cst_22 : f32 to vector<16x16xf32>
    %70 = arith.cmpf ogt, %68, %69 : vector<16x16xf32>
    %cst_23 = arith.constant 2.000000e-01 : f32
    %71 = vector.broadcast %cst_23 : f32 to vector<16x16xf32>
    %72 = arith.mulf %68, %71 : vector<16x16xf32>
    %73 = arith.select %70, %68, %72 : vector<16x16xi1>, vector<16x16xf32>
    %cst_24 = arith.constant dense<0xFF800000> : vector<16xf32>
    %74 = vector.multi_reduction <maximumf>, %73, %cst_24 [1] : vector<16x16xf32> to vector<16xf32>
    %75 = vector.shape_cast %74 : vector<16xf32> to vector<16x1xf32>
    %76 = vector.broadcast %75 : vector<16x1xf32> to vector<16x16xf32>
    %77 = arith.subf %73, %76 : vector<16x16xf32>
    %78 = math.exp %77 : vector<16x16xf32>
    %cst_25 = arith.constant dense<0.000000e+00> : vector<16xf32>
    %79 = vector.multi_reduction <add>, %78, %cst_25 [1] : vector<16x16xf32> to vector<16xf32>
    %80 = vector.shape_cast %79 : vector<16xf32> to vector<16x1xf32>
    %81 = arith.truncf %78 : vector<16x16xf32> to vector<16x16xbf16>
    %82 = vector.extract_strided_slice %0 {offsets = [0, 64], sizes = [16, 32], strides = [1, 1]} : vector<16x128xbf16> to vector<16x32xbf16>
    %cst_26 = arith.constant dense<0.000000e+00> : vector<16x32xf32>
    %83 = tpu.matmul %81, %82, %cst_26 {dimension_numbers = #tpu.dot_dimension_numbers<[1], [0], [0], [1], [0, 0, 1, 1], [], []>} : vector<16x16xbf16>, vector<16x32xbf16>, vector<16x32xf32> -> vector<16x32xf32>
    %84 = tpu.reciprocal %80 {approx = true} : vector<16x1xf32> -> vector<16x1xf32>
    %85 = vector.broadcast %84 : vector<16x1xf32> to vector<16x32xf32>
    %86 = arith.mulf %83, %85 : vector<16x32xf32>
    %87 = arith.addf %59, %86 : vector<16x32xf32>
    %88 = vector.extract_strided_slice %1 {offsets = [0, 3], sizes = [16, 1], strides = [1, 1]} : vector<16x4xf32> to vector<16x1xf32>
    %89 = vector.extract_strided_slice %2 {offsets = [3, 0], sizes = [1, 16], strides = [1, 1]} : vector<4x16xf32> to vector<1x16xf32>
    %90 = vector.broadcast %88 : vector<16x1xf32> to vector<16x16xf32>
    %91 = vector.broadcast %89 : vector<1x16xf32> to vector<16x16xf32>
    %92 = arith.addf %90, %91 : vector<16x16xf32>
    %c3 = arith.constant 3 : index
    %c0_27 = arith.constant 0 : index
    %c0_28 = arith.constant 0 : index
    %93 = vector.load %arg4[%c3, %c0_27, %c0_28] : memref<4x16x16xbf16, #tpu.memory_space<vmem>>, vector<1x16x16xbf16>
    %94 = vector.shape_cast %93 : vector<1x16x16xbf16> to vector<16x16xbf16>
    %95 = arith.extf %94 : vector<16x16xbf16> to vector<16x16xf32>
    %96 = arith.addf %92, %95 : vector<16x16xf32>
    %cst_29 = arith.constant 0.000000e+00 : f32
    %97 = vector.broadcast %cst_29 : f32 to vector<16x16xf32>
    %98 = arith.cmpf ogt, %96, %97 : vector<16x16xf32>
    %cst_30 = arith.constant 2.000000e-01 : f32
    %99 = vector.broadcast %cst_30 : f32 to vector<16x16xf32>
    %100 = arith.mulf %96, %99 : vector<16x16xf32>
    %101 = arith.select %98, %96, %100 : vector<16x16xi1>, vector<16x16xf32>
    %cst_31 = arith.constant dense<0xFF800000> : vector<16xf32>
    %102 = vector.multi_reduction <maximumf>, %101, %cst_31 [1] : vector<16x16xf32> to vector<16xf32>
    %103 = vector.shape_cast %102 : vector<16xf32> to vector<16x1xf32>
    %104 = vector.broadcast %103 : vector<16x1xf32> to vector<16x16xf32>
    %105 = arith.subf %101, %104 : vector<16x16xf32>
    %106 = math.exp %105 : vector<16x16xf32>
    %cst_32 = arith.constant dense<0.000000e+00> : vector<16xf32>
    %107 = vector.multi_reduction <add>, %106, %cst_32 [1] : vector<16x16xf32> to vector<16xf32>
    %108 = vector.shape_cast %107 : vector<16xf32> to vector<16x1xf32>
    %109 = arith.truncf %106 : vector<16x16xf32> to vector<16x16xbf16>
    %110 = vector.extract_strided_slice %0 {offsets = [0, 96], sizes = [16, 32], strides = [1, 1]} : vector<16x128xbf16> to vector<16x32xbf16>
    %cst_33 = arith.constant dense<0.000000e+00> : vector<16x32xf32>
    %111 = tpu.matmul %109, %110, %cst_33 {dimension_numbers = #tpu.dot_dimension_numbers<[1], [0], [0], [1], [0, 0, 1, 1], [], []>} : vector<16x16xbf16>, vector<16x32xbf16>, vector<16x32xf32> -> vector<16x32xf32>
    %112 = tpu.reciprocal %108 {approx = true} : vector<16x1xf32> -> vector<16x1xf32>
    %113 = vector.broadcast %112 : vector<16x1xf32> to vector<16x32xf32>
    %114 = arith.mulf %111, %113 : vector<16x32xf32>
    %115 = arith.addf %87, %114 : vector<16x32xf32>
    %cst_34 = arith.constant 2.500000e-01 : f32
    %116 = vector.broadcast %cst_34 : f32 to vector<16x32xf32>
    %117 = arith.mulf %115, %116 : vector<16x32xf32>
    %cst_35 = arith.constant 0.000000e+00 : f32
    %118 = vector.broadcast %cst_35 : f32 to vector<16x32xf32>
    %119 = arith.cmpf ogt, %117, %118 : vector<16x32xf32>
    %cst_36 = arith.constant 0.000000e+00 : f32
    %120 = vector.broadcast %cst_36 : f32 to vector<16x32xf32>
    %121 = arith.minimumf %117, %120 : vector<16x32xf32>
    %122 = math.exp %121 : vector<16x32xf32>
    %cst_37 = arith.constant 1.000000e+00 : f32
    %123 = vector.broadcast %cst_37 : f32 to vector<16x32xf32>
    %124 = arith.subf %122, %123 : vector<16x32xf32>
    %125 = arith.select %119, %117, %124 : vector<16x32xi1>, vector<16x32xf32>
    %c0_38 = arith.constant 0 : index
    %c0_39 = arith.constant 0 : index
    %126 = vector.load %arg5[%c0_38, %c0_39] : memref<16x32xf32, #tpu.memory_space<vmem>>, vector<16x32xf32>
    tpu.vector_store %arg5[%c0_38, %c0_39], %125 {strides = array<i32>} : memref<16x32xf32, #tpu.memory_space<vmem>>, vector<16x32xf32>,
    return
  }
  func.func @transform_0(%arg0: i32) -> (i32, i32) {
    %c0_i32 = arith.constant 0 : i32
    %c0_i32_0 = arith.constant 0 : i32
    %c0_i32_1 = arith.constant 0 : i32
    return %c0_i32, %c0_i32_0 : i32, i32
  }
  func.func @transform_1(%arg0: i32) -> (i32, i32) {
    %c0_i32 = arith.constant 0 : i32
    %c0_i32_0 = arith.constant 0 : i32
    return %arg0, %c0_i32 : i32, i32
  }
  func.func @transform_2(%arg0: i32) -> (i32, i32) {
    %c0_i32 = arith.constant 0 : i32
    %c0_i32_0 = arith.constant 0 : i32
    %c0_i32_1 = arith.constant 0 : i32
    return %c0_i32, %c0_i32_0 : i32, i32
  }
  func.func @transform_3(%arg0: i32) -> (i32, i32, i32) {
    %c0_i32 = arith.constant 0 : i32
    %c0_i32_0 = arith.constant 0 : i32
    %c0_i32_1 = arith.constant 0 : i32
    return %c0_i32, %arg0, %c0_i32_0 : i32, i32, i32
  }
  func.func @transform_4(%arg0: i32) -> (i32, i32) {
    %c0_i32 = arith.constant 0 : i32
    %c0_i32_0 = arith.constant 0 : i32
    return %arg0, %c0_i32 : i32, i32
  }
}

module attributes {stable_mosaic.version = 11 : i64} {
  func.func @govern_conv_kernel(%arg0: i32, %arg1: memref<16x128xbf16, #tpu.memory_space<vmem>>, %arg2: memref<16x4xf32, #tpu.memory_space<vmem>>, %arg3: memref<4x16xf32, #tpu.memory_space<vmem>>, %arg4: memref<4x16x16xbf16, #tpu.memory_space<vmem>>, %arg5: memref<16x32xf32, #tpu.memory_space<vmem>>) attributes {dimension_semantics = [#tpu.dimension_semantics<parallel>], iteration_bounds = array<i64: 1>, scalar_prefetch = 0 : i64, scratch_operands = 0 : i64, tpu.core_type = #tpu.core_type<tc>, window_params = [{pipeline_mode = #tpu.pipeline_mode<synchronous>, transform_indices = @transform_0, window_bounds = array<i64: 16, 128>}, {transform_indices = @transform_1, window_bounds = array<i64: 16, 4>}, {pipeline_mode = #tpu.pipeline_mode<synchronous>, transform_indices = @transform_2, window_bounds = array<i64: 4, 16>}, {transform_indices = @transform_3, window_bounds = array<i64: 4, 16, 16>}, {transform_indices = @transform_4, window_bounds = array<i64: 16, 32>}]} {
    %c0 = arith.constant 0 : index
    %c0_0 = arith.constant 0 : index
    %0 = vector.load %arg1[%c0, %c0_0] : memref<16x128xbf16, #tpu.memory_space<vmem>>, vector<16x128xbf16>
    %c0_1 = arith.constant 0 : index
    %c0_2 = arith.constant 0 : index
    %1 = vector.load %arg2[%c0_1, %c0_2] : memref<16x4xf32, #tpu.memory_space<vmem>>, vector<16x4xf32>
    %c0_3 = arith.constant 0 : index
    %c0_4 = arith.constant 0 : index
    %2 = vector.load %arg3[%c0_3, %c0_4] : memref<4x16xf32, #tpu.memory_space<vmem>>, vector<4x16xf32>
    %cst = arith.constant 0.000000e+00 : f32
    %3 = vector.broadcast %cst : f32 to vector<16x32xf32>
    %4 = vector.extract_strided_slice %1 {offsets = [0, 0], sizes = [16, 1], strides = [1, 1]} : vector<16x4xf32> to vector<16x1xf32>
    %5 = vector.extract_strided_slice %2 {offsets = [0, 0], sizes = [1, 16], strides = [1, 1]} : vector<4x16xf32> to vector<1x16xf32>
    %6 = vector.broadcast %4 : vector<16x1xf32> to vector<16x16xf32>
    %7 = vector.broadcast %5 : vector<1x16xf32> to vector<16x16xf32>
    %8 = arith.addf %6, %7 : vector<16x16xf32>
    %c0_5 = arith.constant 0 : index
    %c0_6 = arith.constant 0 : index
    %c0_7 = arith.constant 0 : index
    %9 = vector.load %arg4[%c0_5, %c0_6, %c0_7] : memref<4x16x16xbf16, #tpu.memory_space<vmem>>, vector<1x16x16xbf16>
    %10 = vector.shape_cast %9 : vector<1x16x16xbf16> to vector<16x16xbf16>
    %11 = arith.extf %10 : vector<16x16xbf16> to vector<16x16xf32>
    %12 = arith.addf %8, %11 : vector<16x16xf32>
    %cst_8 = arith.constant 0.000000e+00 : f32
    %13 = vector.broadcast %cst_8 : f32 to vector<16x16xf32>
    %14 = arith.cmpf ogt, %12, %13 : vector<16x16xf32>
    %cst_9 = arith.constant 2.000000e-01 : f32
    %15 = vector.broadcast %cst_9 : f32 to vector<16x16xf32>
    %16 = arith.mulf %12, %15 : vector<16x16xf32>
    %17 = arith.select %14, %12, %16 : vector<16x16xi1>, vector<16x16xf32>
    %cst_10 = arith.constant dense<0xFF800000> : vector<16xf32>
    %18 = vector.multi_reduction <maximumf>, %17, %cst_10 [1] : vector<16x16xf32> to vector<16xf32>
    %19 = vector.shape_cast %18 : vector<16xf32> to vector<16x1xf32>
    %20 = vector.broadcast %19 : vector<16x1xf32> to vector<16x16xf32>
    %21 = arith.subf %17, %20 : vector<16x16xf32>
    %22 = math.exp %21 : vector<16x16xf32>
    %cst_11 = arith.constant dense<0.000000e+00> : vector<16xf32>
    %23 = vector.multi_reduction <add>, %22, %cst_11 [1] : vector<16x16xf32> to vector<16xf32>
    %24 = vector.shape_cast %23 : vector<16xf32> to vector<16x1xf32>
    %25 = arith.truncf %22 : vector<16x16xf32> to vector<16x16xbf16>
    %26 = vector.extract_strided_slice %0 {offsets = [0, 0], sizes = [16, 32], strides = [1, 1]} : vector<16x128xbf16> to vector<16x32xbf16>
    %cst_12 = arith.constant dense<0.000000e+00> : vector<16x32xf32>
    %27 = tpu.matmul %25, %26, %cst_12 {dimension_numbers = #tpu.dot_dimension_numbers<[1], [0], [0], [1], [0, 0, 1, 1], [], []>} : vector<16x16xbf16>, vector<16x32xbf16>, vector<16x32xf32> -> vector<16x32xf32>
    %28 = tpu.reciprocal %24 {approx = true} : vector<16x1xf32> -> vector<16x1xf32>
    %29 = vector.broadcast %28 : vector<16x1xf32> to vector<16x32xf32>
    %30 = arith.mulf %27, %29 : vector<16x32xf32>
    %31 = arith.addf %3, %30 : vector<16x32xf32>
    %32 = vector.extract_strided_slice %1 {offsets = [0, 1], sizes = [16, 1], strides = [1, 1]} : vector<16x4xf32> to vector<16x1xf32>
    %33 = vector.extract_strided_slice %2 {offsets = [1, 0], sizes = [1, 16], strides = [1, 1]} : vector<4x16xf32> to vector<1x16xf32>
    %34 = vector.broadcast %32 : vector<16x1xf32> to vector<16x16xf32>
    %35 = vector.broadcast %33 : vector<1x16xf32> to vector<16x16xf32>
    %36 = arith.addf %34, %35 : vector<16x16xf32>
    %c1 = arith.constant 1 : index
    %c0_13 = arith.constant 0 : index
    %c0_14 = arith.constant 0 : index
    %37 = vector.load %arg4[%c1, %c0_13, %c0_14] : memref<4x16x16xbf16, #tpu.memory_space<vmem>>, vector<1x16x16xbf16>
    %38 = vector.shape_cast %37 : vector<1x16x16xbf16> to vector<16x16xbf16>
    %39 = arith.extf %38 : vector<16x16xbf16> to vector<16x16xf32>
    %40 = arith.addf %36, %39 : vector<16x16xf32>
    %cst_15 = arith.constant 0.000000e+00 : f32
    %41 = vector.broadcast %cst_15 : f32 to vector<16x16xf32>
    %42 = arith.cmpf ogt, %40, %41 : vector<16x16xf32>
    %cst_16 = arith.constant 2.000000e-01 : f32
    %43 = vector.broadcast %cst_16 : f32 to vector<16x16xf32>
    %44 = arith.mulf %40, %43 : vector<16x16xf32>
    %45 = arith.select %42, %40, %44 : vector<16x16xi1>, vector<16x16xf32>
    %cst_17 = arith.constant dense<0xFF800000> : vector<16xf32>
    %46 = vector.multi_reduction <maximumf>, %45, %cst_17 [1] : vector<16x16xf32> to vector<16xf32>
    %47 = vector.shape_cast %46 : vector<16xf32> to vector<16x1xf32>
    %48 = vector.broadcast %47 : vector<16x1xf32> to vector<16x16xf32>
    %49 = arith.subf %45, %48 : vector<16x16xf32>
    %50 = math.exp %49 : vector<16x16xf32>
    %cst_18 = arith.constant dense<0.000000e+00> : vector<16xf32>
    %51 = vector.multi_reduction <add>, %50, %cst_18 [1] : vector<16x16xf32> to vector<16xf32>
    %52 = vector.shape_cast %51 : vector<16xf32> to vector<16x1xf32>
    %53 = arith.truncf %50 : vector<16x16xf32> to vector<16x16xbf16>
    %54 = vector.extract_strided_slice %0 {offsets = [0, 32], sizes = [16, 32], strides = [1, 1]} : vector<16x128xbf16> to vector<16x32xbf16>
    %cst_19 = arith.constant dense<0.000000e+00> : vector<16x32xf32>
    %55 = tpu.matmul %53, %54, %cst_19 {dimension_numbers = #tpu.dot_dimension_numbers<[1], [0], [0], [1], [0, 0, 1, 1], [], []>} : vector<16x16xbf16>, vector<16x32xbf16>, vector<16x32xf32> -> vector<16x32xf32>
    %56 = tpu.reciprocal %52 {approx = true} : vector<16x1xf32> -> vector<16x1xf32>
    %57 = vector.broadcast %56 : vector<16x1xf32> to vector<16x32xf32>
    %58 = arith.mulf %55, %57 : vector<16x32xf32>
    %59 = arith.addf %31, %58 : vector<16x32xf32>
    %60 = vector.extract_strided_slice %1 {offsets = [0, 2], sizes = [16, 1], strides = [1, 1]} : vector<16x4xf32> to vector<16x1xf32>
    %61 = vector.extract_strided_slice %2 {offsets = [2, 0], sizes = [1, 16], strides = [1, 1]} : vector<4x16xf32> to vector<1x16xf32>
    %62 = vector.broadcast %60 : vector<16x1xf32> to vector<16x16xf32>
    %63 = vector.broadcast %61 : vector<1x16xf32> to vector<16x16xf32>
    %64 = arith.addf %62, %63 : vector<16x16xf32>
    %c2 = arith.constant 2 : index
    %c0_20 = arith.constant 0 : index
    %c0_21 = arith.constant 0 : index
    %65 = vector.load %arg4[%c2, %c0_20, %c0_21] : memref<4x16x16xbf16, #tpu.memory_space<vmem>>, vector<1x16x16xbf16>
    %66 = vector.shape_cast %65 : vector<1x16x16xbf16> to vector<16x16xbf16>
    %67 = arith.extf %66 : vector<16x16xbf16> to vector<16x16xf32>
    %68 = arith.addf %64, %67 : vector<16x16xf32>
    %cst_22 = arith.constant 0.000000e+00 : f32
    %69 = vector.broadcast %cst_22 : f32 to vector<16x16xf32>
    %70 = arith.cmpf ogt, %68, %69 : vector<16x16xf32>
    %cst_23 = arith.constant 2.000000e-01 : f32
    %71 = vector.broadcast %cst_23 : f32 to vector<16x16xf32>
    %72 = arith.mulf %68, %71 : vector<16x16xf32>
    %73 = arith.select %70, %68, %72 : vector<16x16xi1>, vector<16x16xf32>
    %cst_24 = arith.constant dense<0xFF800000> : vector<16xf32>
    %74 = vector.multi_reduction <maximumf>, %73, %cst_24 [1] : vector<16x16xf32> to vector<16xf32>
    %75 = vector.shape_cast %74 : vector<16xf32> to vector<16x1xf32>
    %76 = vector.broadcast %75 : vector<16x1xf32> to vector<16x16xf32>
    %77 = arith.subf %73, %76 : vector<16x16xf32>
    %78 = math.exp %77 : vector<16x16xf32>
    %cst_25 = arith.constant dense<0.000000e+00> : vector<16xf32>
    %79 = vector.multi_reduction <add>, %78, %cst_25 [1] : vector<16x16xf32> to vector<16xf32>
    %80 = vector.shape_cast %79 : vector<16xf32> to vector<16x1xf32>
    %81 = arith.truncf %78 : vector<16x16xf32> to vector<16x16xbf16>
    %82 = vector.extract_strided_slice %0 {offsets = [0, 64], sizes = [16, 32], strides = [1, 1]} : vector<16x128xbf16> to vector<16x32xbf16>
    %cst_26 = arith.constant dense<0.000000e+00> : vector<16x32xf32>
    %83 = tpu.matmul %81, %82, %cst_26 {dimension_numbers = #tpu.dot_dimension_numbers<[1], [0], [0], [1], [0, 0, 1, 1], [], []>} : vector<16x16xbf16>, vector<16x32xbf16>, vector<16x32xf32> -> vector<16x32xf32>
    %84 = tpu.reciprocal %80 {approx = true} : vector<16x1xf32> -> vector<16x1xf32>
    %85 = vector.broadcast %84 : vector<16x1xf32> to vector<16x32xf32>
    %86 = arith.mulf %83, %85 : vector<16x32xf32>
    %87 = arith.addf %59, %86 : vector<16x32xf32>
    %88 = vector.extract_strided_slice %1 {offsets = [0, 3], sizes = [16, 1], strides = [1, 1]} : vector<16x4xf32> to vector<16x1xf32>
    %89 = vector.extract_strided_slice %2 {offsets = [3, 0], sizes = [1, 16], strides = [1, 1]} : vector<4x16xf32> to vector<1x16xf32>
    %90 = vector.broadcast %88 : vector<16x1xf32> to vector<16x16xf32>
    %91 = vector.broadcast %89 : vector<1x16xf32> to vector<16x16xf32>
    %92 = arith.addf %90, %91 : vector<16x16xf32>
    %c3 = arith.constant 3 : index
    %c0_27 = arith.constant 0 : index
    %c0_28 = arith.constant 0 : index
    %93 = vector.load %arg4[%c3, %c0_27, %c0_28] : memref<4x16x16xbf16, #tpu.memory_space<vmem>>, vector<1x16x16xbf16>
    %94 = vector.shape_cast %93 : vector<1x16x16xbf16> to vector<16x16xbf16>
    %95 = arith.extf %94 : vector<16x16xbf16> to vector<16x16xf32>
    %96 = arith.addf %92, %95 : vector<16x16xf32>
    %cst_29 = arith.constant 0.000000e+00 : f32
    %97 = vector.broadcast %cst_29 : f32 to vector<16x16xf32>
    %98 = arith.cmpf ogt, %96, %97 : vector<16x16xf32>
    %cst_30 = arith.constant 2.000000e-01 : f32
    %99 = vector.broadcast %cst_30 : f32 to vector<16x16xf32>
    %100 = arith.mulf %96, %99 : vector<16x16xf32>
    %101 = arith.select %98, %96, %100 : vector<16x16xi1>, vector<16x16xf32>
    %cst_31 = arith.constant dense<0xFF800000> : vector<16xf32>
    %102 = vector.multi_reduction <maximumf>, %101, %cst_31 [1] : vector<16x16xf32> to vector<16xf32>
    %103 = vector.shape_cast %102 : vector<16xf32> to vector<16x1xf32>
    %104 = vector.broadcast %103 : vector<16x1xf32> to vector<16x16xf32>
    %105 = arith.subf %101, %104 : vector<16x16xf32>
    %106 = math.exp %105 : vector<16x16xf32>
    %cst_32 = arith.constant dense<0.000000e+00> : vector<16xf32>
    %107 = vector.multi_reduction <add>, %106, %cst_32 [1] : vector<16x16xf32> to vector<16xf32>
    %108 = vector.shape_cast %107 : vector<16xf32> to vector<16x1xf32>
    %109 = arith.truncf %106 : vector<16x16xf32> to vector<16x16xbf16>
    %110 = vector.extract_strided_slice %0 {offsets = [0, 96], sizes = [16, 32], strides = [1, 1]} : vector<16x128xbf16> to vector<16x32xbf16>
    %cst_33 = arith.constant dense<0.000000e+00> : vector<16x32xf32>
    %111 = tpu.matmul %109, %110, %cst_33 {dimension_numbers = #tpu.dot_dimension_numbers<[1], [0], [0], [1], [0, 0, 1, 1], [], []>} : vector<16x16xbf16>, vector<16x32xbf16>, vector<16x32xf32> -> vector<16x32xf32>
    %112 = tpu.reciprocal %108 {approx = true} : vector<16x1xf32> -> vector<16x1xf32>
    %113 = vector.broadcast %112 : vector<16x1xf32> to vector<16x32xf32>
    %114 = arith.mulf %111, %113 : vector<16x32xf32>
    %115 = arith.addf %87, %114 : vector<16x32xf32>
    %cst_34 = arith.constant 2.500000e-01 : f32
    %116 = vector.broadcast %cst_34 : f32 to vector<16x32xf32>
    %117 = arith.mulf %115, %116 : vector<16x32xf32>
    %cst_35 = arith.constant 0.000000e+00 : f32
    %118 = vector.broadcast %cst_35 : f32 to vector<16x32xf32>
    %119 = arith.cmpf ogt, %117, %118 : vector<16x32xf32>
    %cst_36 = arith.constant 0.000000e+00 : f32
    %120 = vector.broadcast %cst_36 : f32 to vector<16x32xf32>
    %121 = arith.minimumf %117, %120 : vector<16x32xf32>
    %122 = math.exp %121 : vector<16x32xf32>
    %cst_37 = arith.constant 1.000000e+00 : f32
    %123 = vector.broadcast %cst_37 : f32 to vector<16x32xf32>
    %124 = arith.subf %122, %123 : vector<16x32xf32>
    %125 = arith.select %119, %117, %124 : vector<16x32xi1>, vector<16x32xf32>
    %c0_38 = arith.constant 0 : index
    %c0_39 = arith.constant 0 : index
    %126 = vector.load %arg5[%c0_38, %c0_39] : memref<16x32xf32, #tpu.memory_space<vmem>>, vector<16x32xf32>
    tpu.vector_store %arg5[%c0_38, %c0_39], %125 {strides = array<i32>} : memref<16x32xf32, #tpu.memory_space<vmem>>, vector<16x32xf32>,
    return
  }
  func.func @transform_0(%arg0: i32) -> (i32, i32) {
    %c0_i32 = arith.constant 0 : i32
    %c0_i32_0 = arith.constant 0 : i32
    %c0_i32_1 = arith.constant 0 : i32
    return %c0_i32, %c0_i32_0 : i32, i32
  }
  func.func @transform_1(%arg0: i32) -> (i32, i32) {
    %c0_i32 = arith.constant 0 : i32
    %c0_i32_0 = arith.constant 0 : i32
    return %arg0, %c0_i32 : i32, i32
  }
  func.func @transform_2(%arg0: i32) -> (i32, i32) {
    %c0_i32 = arith.constant 0 : i32
    %c0_i32_0 = arith.constant 0 : i32
    %c0_i32_1 = arith.constant 0 : i32
    return %c0_i32, %c0_i32_0 : i32, i32
  }
  func.func @transform_3(%arg0: i32) -> (i32, i32, i32) {
    %c0_i32 = arith.constant 0 : i32
    %c0_i32_0 = arith.constant 0 : i32
    %c0_i32_1 = arith.constant 0 : i32
    return %c0_i32, %arg0, %c0_i32_0 : i32, i32, i32
  }
  func.func @transform_4(%arg0: i32) -> (i32, i32) {
    %c0_i32 = arith.constant 0 : i32
    %c0_i32_0 = arith.constant 0 : i32
    return %arg0, %c0_i32 : i32, i32
  }
}

</mosaic_0001>

<bundles_post_ra>
// kernel: govern_encoder_forward.2
= control target key start
LH: loop header
LB: loop body
LE: loop exit
PB: predicated region body
PF: predicated region fallthrough
CT: control target
= control target key end

     0   :  { %v561_v0 = vmov 1   ;;  %v562_v1 = vmov 0   ;;  %v563_v4 = vmov 2   ;;  %v564_v5 = vmov 3   ;;  %s565_s21 = smov 96   ;;  %s569_s29 = smov 64   ;;  %s671_s1 = inlined_call_operand.vmem [shape: f32[16,4], index: 1, kind: input, shape index: {}]   ;;  %s672_s0 = inlined_call_operand.vmem [shape: bf16[16,128], index: 0, kind: input, shape index: {}]   ;;  %s673_s2 = inlined_call_operand.vmem [shape: f32[4,16], index: 2, kind: input, shape index: {}]   ;;  %s674_s3 = inlined_call_operand.vmem [shape: bf16[4,16,16], index: 3, kind: input, shape index: {}]   ;;  %s675_s4 = inlined_call_operand.vmem [shape: f32[16,32], index: 4, kind: output, shape index: {}]  }
   0x1   :  { %519 = vset.pattern.permute.xlu1 %v561_v0  ;;  %518 = vset.pattern.permute.xlu0 %v562_v1  ;;  %v20_v2 = vld [vmem:[%s671_s1] sm:$0xff]  ;;  %v21_v3 = vld [vmem:[%s671_s1 + $0x8] sm:$0xff]  ;;  %v566_v7 = vmov 0.0   ;;  %v33_v8 = vlaneseq  ;;  %vm51_vm0 = vcmask 130048   ;;  %v475_v32 = vld [vmem:[%s674_s3 + $0x10] sm:$0xff]   ;;  %vm568_vm9 = vmmov 0  }
   0x2   :  { %128 = vperm.xlu1 %519, %v20_v2   ;;  %25 = vperm.xlu0 %518, %v20_v2   ;;  %v604_v6 = vld [vmem:[%s672_s0] sm:$0xff]   ;;  %v474_v13 = vld [vmem:[%s674_s3 + $0x8] sm:$0xff]   ;;  %v469_v40 = vunpack.c.h.bf16 %v475_v32  ;;  %v468_v41 = vunpack.c.l.bf16 %v475_v32  ;;  %v476_v49 = vld [vmem:[%s674_s3 + $0x18] sm:$0xff]   ;;  %vm438_vm10 = vcmask 261120  }
   0x3   :  { %491 = vmatprep.subr.bf16.mxu1 %v566_v7  ;;  %485 = vmatprep.subr.bf16.mxu0 %v566_v7  ;;  %v34_v9 = vshrl.u32 %v33_v8, 7  ;;  %v22_v12 = vld [vmem:[%s673_s2] sm:$0xf]  ;;  %v464_v17 = vunpack.c.l.bf16 %v474_v13  ;;  %v465_v26 = vunpack.c.h.bf16 %v474_v13  ;;  %v472_v57 = vunpack.c.l.bf16 %v476_v49 }
   0x4   :  { %486 = vmatpush3.bf16.msra.mxu0 %v604_v6  ;;  %v459_v14 = vld [vmem:[%s674_s3] sm:$0xff]   ;;  %v473_v58 = vunpack.c.h.bf16 %v476_v49  ;;  %s567_s3 = smov 32   ;;  %487 = vmatprep.mubr.msk.bf16.mxu0 %vm568_vm9, %v566_v7 }
   0x5   :  { %497 = vmatprep.subr.bf16.mxu0 %v566_v7  ;;  %v137_v10 = vsub.s32 1, %v34_v9  ;;  %v35_v11 = vsub.s32 0, %v34_v9  ;;  %v460_v18 = vunpack.c.l.bf16 %v459_v14  ;;  %v236_v23 = vsub.s32 2, %v34_v9  ;;  %493 = vmatprep.mubr.msk.bf16.mxu1 %vm568_vm9, %v566_v7 }
   0x6   :  { %132 = vperm.xlu1 %519, %v21_v3   ;;  %30 = vperm.xlu0 %518, %v21_v3   ;;  %v461_v27 = vunpack.c.h.bf16 %v459_v14  ;;  %v335_v39 = vsub.s32 3, %v34_v9 }
   0x7   :  { %v138_v15 = vrot.slane %v22_v12, %v137_v10  ;;  %v36_v16 = vrot.slane %v22_v12, %v35_v11  ;;  %v237_v34 = vrot.slane %v22_v12, %v236_v23 }
   0x8   :  { %v336_v52 = vrot.slane %v22_v12, %v335_v39 }
   0xa   :  { %521 = vset.pattern.permute.xlu1 %v563_v4  ;;  %520 = vset.pattern.permute.xlu0 %v563_v4 }
   0xb   :  { %231 = vperm.xlu1 %521, %v21_v3   ;;  %227 = vperm.xlu0 %520, %v20_v2  }
   0xf   :  { %522 = vset.pattern.permute.xlu1 %v564_v5  ;;  %523 = vset.pattern.permute.xlu0 %v564_v5 }
  0x10   :  { %326 = vperm.xlu1 %522, %v20_v2   ;;  %330 = vperm.xlu0 %523, %v21_v3  }
  0x14   :  { %173 = vrot.lane.b32.xlu1 %v604_v6, %s565_s21 }
  0x7d   :  { %v129_v19 = vpop.permute.xlu1 %128  ;;  %v26_v20 = vpop.permute.xlu0 %25 }
  0x7e   :  { %v139_v21 = vadd.f32 %v138_v15, %v129_v19  ;;  %v37_v22 = vadd.f32 %v36_v16, %v26_v20 }
  0x80   :  { %v146_v24 = vadd.f32 %v464_v17, %v139_v21  ;;  %v43_v25 = vadd.f32 %v460_v18, %v37_v22 }
  0x81   :  { %v133_v28 = vpop.permute.xlu1 %132  ;;  %v31_v29 = vpop.permute.xlu0 %30 }
  0x82   :  { %v140_v30 = vadd.f32 %v138_v15, %v133_v28  ;;  %v38_v31 = vadd.f32 %v36_v16, %v31_v29  ;;  %vm45_vm1 = vcmp.gt.f32.partialorder %v43_v25, 0.0  ;;  %v47_v33 = vmul.f32 0.2, %v43_v25 }
  0x83   :  { %vm148_vm2 = vcmp.gt.f32.partialorder %v146_v24, 0.0  ;;  %v150_v35 = vmul.f32 0.2, %v146_v24 }
  0x84   :  { %v147_v36 = vadd.f32 %v465_v26, %v140_v30  ;;  %v44_v37 = vadd.f32 %v461_v27, %v38_v31  ;;  %v623_v38 = vsel %vm45_vm1, %v43_v25, %v47_v33 }
  0x85   :  { %v52_v42 = vsel %vm51_vm0, %v623_v38, -inf  ;;  %v627_v46 = vsel %vm148_vm2, %v146_v24, %v150_v35 }
  0x86   :  { %v232_v43 = vpop.permute.xlu1 %231  ;;  %v228_v44 = vpop.permute.xlu0 %227  ;;  %53 = vmax.xlane.f32.xlu1 %v52_v42  ;;  %vm46_vm3 = vcmp.gt.f32.partialorder %v44_v37, 0.0  ;;  %v48_v45 = vmul.f32 0.2, %v44_v37  ;;  %vm149_vm4 = vcmp.gt.f32.partialorder %v147_v36, 0.0  ;;  %v151_v50 = vmul.f32 0.2, %v147_v36 }
  0x87   :  { %v239_v47 = vadd.f32 %v237_v34, %v232_v43  ;;  %v238_v48 = vadd.f32 %v237_v34, %v228_v44  ;;  %v154_v56 = vsel %vm51_vm0, %v627_v46, -inf }
  0x88   :  { %v50_v51 = vsel %vm46_vm3, %v44_v37, %v48_v45  ;;  %v153_v59 = vsel %vm149_vm4, %v147_v36, %v151_v50 }
  0x89   :  { %v246_v53 = vadd.f32 %v469_v40, %v239_v47  ;;  %v245_v54 = vadd.f32 %v468_v41, %v238_v48  ;;  %v55_v55 = vsel %vm51_vm0, %v50_v51, -inf  ;;  %v157_v2 = vsel %vm51_vm0, %v153_v59, -inf }
  0x8a   :  { %56 = vmax.xlane.f32.xlu0 %v55_v55  ;;  %155 = vmax.xlane.f32.xlu1 %v154_v56 }
  0x8b   :  { %v327_v60 = vpop.permute.xlu1 %326  ;;  %v331_v61 = vpop.permute.xlu0 %330  ;;  %vm247_vm5 = vcmp.gt.f32.partialorder %v245_v54, 0.0  ;;  %v249_v62 = vmul.f32 0.2, %v245_v54  ;;  %vm248_vm6 = vcmp.gt.f32.partialorder %v246_v53, 0.0  ;;  %v250_v63 = vmul.f32 0.2, %v246_v53 }
  0x8c   :  { %v337_v0 = vadd.f32 %v336_v52, %v327_v60  ;;  %v338_v1 = vadd.f32 %v336_v52, %v331_v61 }
  0x8d   :  { %v251_v3 = vsel %vm247_vm5, %v245_v54, %v249_v62  ;;  %v252_v9 = vsel %vm248_vm6, %v246_v53, %v250_v63 }
  0x8e   :  { %v344_v4 = vadd.f32 %v472_v57, %v337_v0  ;;  %v345_v5 = vadd.f32 %v473_v58, %v338_v1  ;;  %158 = vmax.xlane.f32.xlu0 %v157_v2  ;;  %v253_v8 = vsel %vm51_vm0, %v251_v3, -inf  ;;  %v256_v13 = vsel %vm51_vm0, %v252_v9, -inf }
  0x8f   :  { %254 = vmax.xlane.f32.xlu1 %v253_v8  ;;  %v174_v10 = vpop.permute.xlu1 %173 }
  0x90   :  { %vm346_vm7 = vcmp.gt.f32.partialorder %v344_v4, 0.0  ;;  %v348_v11 = vmul.f32 0.2, %v344_v4  ;;  %vm347_vm8 = vcmp.gt.f32.partialorder %v345_v5, 0.0  ;;  %v349_v12 = vmul.f32 0.2, %v345_v5  ;;  %492 = vmatpush3.bf16.msra.mxu1 %v174_v10 }
  0x91   :  { %503 = vmatprep.subr.bf16.mxu1 %v566_v7 }
  0x92   :  { %257 = vmax.xlane.f32.xlu0 %v256_v13  ;;  %v350_v14 = vsel %vm346_vm7, %v344_v4, %v348_v11  ;;  %v351_v15 = vsel %vm347_vm8, %v345_v5, %v349_v12 }
  0x93   :  { %v352_v16 = vsel %vm51_vm0, %v350_v14, -inf  ;;  %v355_v17 = vsel %vm51_vm0, %v351_v15, -inf }
  0x94   :  { %353 = vmax.xlane.f32.xlu1 %v352_v16 }
  0x96   :  { %356 = vmax.xlane.f32.xlu0 %v355_v17 }
  0xa5   :  { %371 = vrot.lane.b32.xlu1 %v604_v6, %s567_s3 }
  0xac   :  { %272 = vrot.lane.b32.xlu0 %v604_v6, %s569_s29 }
 0x10f   :  { %v54_v18 = vpop.xlane.xlu1 %53 }
 0x110   :  { %v58_v19 = vsub.f32 %v623_v38, %v54_v18 }
 0x112   :  { %v60_v20 = vmul.f32 1.442695, %v58_v19 }
 0x113   :  { %v57_v21 = vpop.xlane.xlu0 %56  ;;  %v156_v22 = vpop.xlane.xlu1 %155 }
 0x114   :  { %525 = vpow2.f32 %v60_v20  ;;  %v59_v23 = vsub.f32 %v50_v51, %v57_v21  ;;  %v160_v24 = vsub.f32 %v627_v46, %v156_v22 }
 0x116   :  { %v62_v25 = vmul.f32 1.442695, %v59_v23  ;;  %v162_v26 = vmul.f32 1.442695, %v160_v24 }
 0x117   :  { %v159_v27 = vpop.xlane.xlu0 %158 }
 0x118   :  { %527 = vpow2.f32 %v62_v25  ;;  %v161_v28 = vsub.f32 %v153_v59, %v159_v27  ;;  %v255_v29 = vpop.xlane.xlu1 %254 }
 0x119   :  { %v259_v30 = vsub.f32 %v251_v3, %v255_v29  ;;  %529 = vpow2.f32 %v162_v26 }
 0x11a   :  { %v164_v31 = vmul.f32 1.442695, %v161_v28 }
 0x11b   :  { %v261_v6 = vmul.f32 1.442695, %v259_v30  ;;  %v258_v32 = vpop.xlane.xlu0 %257 }
 0x11c   :  { %531 = vpow2.f32 %v164_v31  ;;  %v260_v33 = vsub.f32 %v252_v9, %v258_v32 }
 0x11d   :  { %v354_v34 = vpop.xlane.xlu1 %353  ;;  %533 = vpow2.f32 %v261_v6 }
 0x11e   :  { %v263_v35 = vmul.f32 1.442695, %v260_v33  ;;  %v358_v36 = vsub.f32 %v350_v14, %v354_v34 }
 0x11f   :  { %v357_v37 = vpop.xlane.xlu0 %356 }
 0x120   :  { %535 = vpow2.f32 %v263_v35  ;;  %v360_v38 = vmul.f32 1.442695, %v358_v36  ;;  %v359_v39 = vsub.f32 %v351_v15, %v357_v37 }
 0x121   :  { %v526_v40 = vpop.eup %525  ;;  %v372_v51 = vpop.permute.xlu1 %371 }
 0x122   :  { %537 = vpow2.f32 %v360_v38  ;;  %v362_v41 = vmul.f32 1.442695, %v359_v39  ;;  %v64_v42 = vsel %vm51_vm0, %v526_v40, 0.0 }
 0x123   :  { %65 = vadd.xlane.f32.xlu1 %v64_v42  ;;  %v273_v46 = vpop.permute.xlu0 %272 }
 0x124   :  { %539 = vpow2.f32 %v362_v41 }
 0x125   :  { %v528_v43 = vpop.eup %527 }
 0x126   :  { %v67_v44 = vsel %vm51_vm0, %v528_v43, 0.0  ;;  %v70_v45 = vpack.c.bf16 %v528_v43, %v526_v40  ;;  %v530_v47 = vpop.eup %529 }
 0x127   :  { %68 = vadd.xlane.f32.xlu0 %v67_v44  ;;  %v166_v50 = vsel %vm51_vm0, %v530_v47, 0.0 }
 0x128   :  { %488 = vmatmul.mubr.msk.bf16.vlgmr.msra.gmra.mxu0 %vm51_vm0, %v70_v45 }
 0x129   :  { %v532_v48 = vpop.eup %531  ;;  %498 = vmatpush3.bf16.msra.mxu0 %v273_v46  ;;  %499 = vmatprep.mubr.msk.bf16.mxu0 %vm568_vm9, %v566_v7 }
 0x12a   :  { %v169_v49 = vsel %vm51_vm0, %v532_v48, 0.0  ;;  %v172_v52 = vpack.c.bf16 %v532_v48, %v530_v47  ;;  %v534_v53 = vpop.eup %533 }
 0x12b   :  { %170 = vadd.xlane.f32.xlu1 %v169_v49  ;;  %167 = vadd.xlane.f32.xlu0 %v166_v50  ;;  %v265_v56 = vsel %vm51_vm0, %v534_v53, 0.0 }
 0x12c   :  { %494 = vmatmul.mubr.msk.bf16.vlgmr.msra.gmra.mxu1 %vm51_vm0, %v172_v52 }
 0x12d   :  { %v536_v54 = vpop.eup %535  ;;  %504 = vmatpush3.bf16.msra.mxu1 %v372_v51  ;;  %505 = vmatprep.mubr.msk.bf16.mxu1 %vm568_vm9, %v566_v7 }
 0x12e   :  { %v268_v55 = vsel %vm51_vm0, %v536_v54, 0.0  ;;  %v271_v57 = vpack.c.bf16 %v536_v54, %v534_v53 }
 0x12f   :  { %v538_v58 = vpop.eup %537  ;;  %269 = vadd.xlane.f32.xlu1 %v268_v55  ;;  %266 = vadd.xlane.f32.xlu0 %v265_v56 }
 0x130   :  { %500 = vmatmul.mubr.msk.bf16.vlgmr.msra.gmra.mxu0 %vm51_vm0, %v271_v57  ;;  %v364_v61 = vsel %vm51_vm0, %v538_v58, 0.0 }
 0x131   :  { %v540_v59 = vpop.eup %539 }
 0x132   :  { %v367_v60 = vsel %vm51_vm0, %v540_v59, 0.0  ;;  %v370_v62 = vpack.c.bf16 %v540_v59, %v538_v58 }
 0x133   :  { %368 = vadd.xlane.f32.xlu1 %v367_v60  ;;  %365 = vadd.xlane.f32.xlu0 %v364_v61 }
 0x134   :  { %506 = vmatmul.mubr.msk.bf16.vlgmr.msra.gmra.mxu1 %vm51_vm0, %v370_v62 }
 0x1ac   :  { %v66_v63 = vpop.xlane.xlu1 %65 }
 0x1b0   :  { %v69_v7 = vpop.xlane.xlu0 %68 }
 0x1b4   :  { %v168_v0 = vpop.xlane.xlu0 %167  ;;  %v171_v1 = vpop.xlane.xlu1 %170 }
 0x1b5   :  { %541 = vrcp.f32 %v168_v0 }
 0x1b6   :  { %543 = vrcp.f32 %v66_v63 }
 0x1b8   :  { %v267_v2 = vpop.xlane.xlu0 %266  ;;  %v270_v3 = vpop.xlane.xlu1 %269 }
 0x1b9   :  { %545 = vrcp.f32 %v267_v2 }
 0x1ba   :  { %547 = vrcp.f32 %v69_v7 }
 0x1bb   :  { %549 = vrcp.f32 %v171_v1 }
 0x1bc   :  { %v366_v4 = vpop.xlane.xlu0 %365  ;;  %551 = vrcp.f32 %v270_v3  ;;  %v369_v5 = vpop.xlane.xlu1 %368 }
 0x1bd   :  { %553 = vrcp.f32 %v366_v4 }
 0x1be   :  { %555 = vrcp.f32 %v369_v5 }
 0x1c2   :  { %v542_v12 = vpop.eup %541 }
 0x1c3   :  { %v544_v15 = vpop.eup %543 }
 0x1c6   :  { %v546_v17 = vpop.eup %545 }
 0x1c7   :  { %v548_v20 = vpop.eup %547 }
 0x1c8   :  { %v550_v23 = vpop.eup %549 }
 0x1c9   :  { %v552_v26 = vpop.eup %551 }
 0x1ca   :  { %v554_v29 = vpop.eup %553 }
 0x1cb   :  { %v556_v39 = vpop.eup %555 }
 0x1e8   :  { %v114_v8 = vpop.f32.mrf.mxu0 }
 0x1e9   :  { %v123_v21 = vmul.f32 %v544_v15, %v114_v8 }
 0x1ea   :  { %v489_v9 = vpop.f32.mrf.mxu0 }
 0x1ec   :  { %v117_v10 = vpop.f32.mrf.mxu0  ;;  %v213_v11 = vpop.f32.mrf.mxu1 }
 0x1ed   :  { %v222_v16 = vmul.f32 %v542_v12, %v213_v11  ;;  %v124_v6 = vmul.f32 %v548_v20, %v117_v10 }
 0x1ee   :  { %v490_v13 = vpop.f32.mrf.mxu0  ;;  %v495_v14 = vpop.f32.mrf.mxu1 }
 0x1ef   :  { %v224_v27 = vadd.f32 %v222_v16, %v123_v21 }
 0x1f0   :  { %v216_v18 = vpop.f32.mrf.mxu1  ;;  %v312_v19 = vpop.f32.mrf.mxu0 }
 0x1f1   :  { %v321_v22 = vmul.f32 %v546_v17, %v312_v19  ;;  %v223_v28 = vmul.f32 %v550_v23, %v216_v18 }
 0x1f2   :  { %v496_v24 = vpop.f32.mrf.mxu1  ;;  %v501_v25 = vpop.f32.mrf.mxu0 }
 0x1f3   :  { %v323_v32 = vadd.f32 %v321_v22, %v224_v27  ;;  %v225_v37 = vadd.f32 %v223_v28, %v124_v6 }
 0x1f4   :  { %v315_v30 = vpop.f32.mrf.mxu0  ;;  %v411_v31 = vpop.f32.mrf.mxu1 }
 0x1f5   :  { %v322_v33 = vmul.f32 %v552_v26, %v315_v30  ;;  %v420_v34 = vmul.f32 %v554_v29, %v411_v31 }
 0x1f6   :  { %v502_v35 = vpop.f32.mrf.mxu0  ;;  %v507_v36 = vpop.f32.mrf.mxu1 }
 0x1f7   :  { %v422_v38 = vadd.f32 %v420_v34, %v323_v32  ;;  %v324_v41 = vadd.f32 %v322_v33, %v225_v37 }
 0x1f8   :  { %v414_v40 = vpop.f32.mrf.mxu1 }
 0x1f9   :  { %v424_v42 = vmul.f32 0.25, %v422_v38  ;;  %v421_v43 = vmul.f32 %v556_v39, %v414_v40 }
 0x1fa   :  { %v508_v44 = vpop.f32.mrf.mxu1 }
 0x1fb   :  { %v428_v45 = vmin.f32 %v424_v42, 0.0  ;;  %v423_v46 = vadd.f32 %v421_v43, %v324_v41  ;;  %vm426_vm11 = vcmp.gt.f32.partialorder %v424_v42, 0.0 }
 0x1fd   :  { %v430_v47 = vmul.f32 1.442695, %v428_v45  ;;  %v425_v48 = vmul.f32 0.25, %v423_v46 }
 0x1ff   :  { %557 = vpow2.f32 %v430_v47  ;;  %v429_v49 = vmin.f32 %v425_v48, 0.0  ;;  %vm427_vm12 = vcmp.gt.f32.partialorder %v425_v48, 0.0 }
 0x201   :  { %v432_v50 = vmul.f32 1.442695, %v429_v49 }
 0x203   :  { %559 = vpow2.f32 %v432_v50 }
 0x20c   :  { %v558_v51 = vpop.eup %557 }
 0x20d   :  { %v456_v52 = vadd.f32 -1.0, %v558_v51 }
 0x20f   :  { %v436_v53 = vsel %vm426_vm11, %v424_v42, %v456_v52 }
 0x210   :  { %v560_v54 = vpop.eup %559  ;;  %439 = vst.msk [vmem:[%s675_s4] sm:$0xff] %vm438_vm10, %v436_v53 }
 0x211   :  { %v457_v55 = vadd.f32 -1.0, %v560_v54 }
 0x213   :  { %v437_v56 = vsel %vm427_vm12, %v425_v48, %v457_v55 }
 0x214   :  { %440 = vst.msk [vmem:[%s675_s4 + $0x8] sm:$0xff] %vm438_vm10, %v437_v56 }

// kernel: govern_encoder_forward.3
= control target key start
LH: loop header
LB: loop body
LE: loop exit
PB: predicated region body
PF: predicated region fallthrough
CT: control target
= control target key end

     0   :  { %v599_v1 = vmov 1   ;;  %v600_v2 = vmov 0   ;;  %s709_s0 = inlined_call_operand.vmem [shape: bf16[16,128], index: 0, kind: input, shape index: {}]   ;;  %s710_s1 = inlined_call_operand.vmem [shape: f32[16,4], index: 1, kind: input, shape index: {}]   ;;  %s711_s2 = inlined_call_operand.vmem [shape: f32[4,16], index: 2, kind: input, shape index: {}]   ;;  %s712_s3 = inlined_call_operand.vmem [shape: bf16[4,16,16], index: 3, kind: input, shape index: {}]   ;;  %s713_s4 = inlined_call_operand.hbm [shape: f32[16,32], index: 4, kind: output, shape index: {}]  }
   0x1   :  { %v21_v0 = vld [vmem:[%s710_s1] sm:$0xff]  ;;  %535 = vset.pattern.permute.xlu1 %v599_v1  ;;  %534 = vset.pattern.permute.xlu0 %v600_v2  ;;  %v22_v3 = vld [vmem:[%s710_s1 + $0x8] sm:$0xff] }
   0x2   :  { %129 = vperm.xlu1 %535, %v21_v0   ;;  %26 = vperm.xlu0 %534, %v21_v0  }
   0x3   :  { %9 = vsyncpa [#allocation3], 0  ;;  %v601_v4 = vmov 2   ;;  %v602_v5 = vmov 3   ;;  %v645_v6 = vld [vmem:[%s709_s0] sm:$0xff]   ;;  %s603_s21 = smov 96   ;;  %v34_v8 = vlaneseq }
   0x4   :  { %v604_v7 = vmov 0.0   ;;  %v23_v12 = vld [vmem:[%s711_s2] sm:$0xf]  ;;  %v487_v13 = vld [vmem:[%s712_s3 + $0x8] sm:$0xff]   ;;  %vm52_vm0 = vcmask 130048   ;;  %v488_v32 = vld [vmem:[%s712_s3 + $0x10] sm:$0xff]  }
   0x5   :  { %504 = vmatprep.subr.bf16.mxu1 %v604_v7  ;;  %498 = vmatprep.subr.bf16.mxu0 %v604_v7  ;;  %v35_v9 = vshrl.u32 %v34_v8, 7  ;;  %v472_v14 = vld [vmem:[%s712_s3] sm:$0xff]   ;;  %v477_v17 = vunpack.c.l.bf16 %v487_v13  ;;  %v478_v26 = vunpack.c.h.bf16 %v487_v13  ;;  %v482_v40 = vunpack.c.h.bf16 %v488_v32  ;;  %v489_v49 = vld [vmem:[%s712_s3 + $0x18] sm:$0xff]   ;;  %s605_s3 = smov 32   ;;  %s607_s29 = smov 64  }
   0x6   :  { %133 = vperm.xlu1 %535, %v22_v3   ;;  %31 = vperm.xlu0 %534, %v22_v3   ;;  %v473_v18 = vunpack.c.l.bf16 %v472_v14  ;;  %v474_v27 = vunpack.c.h.bf16 %v472_v14  ;;  %v481_v41 = vunpack.c.l.bf16 %v488_v32  ;;  %v485_v57 = vunpack.c.l.bf16 %v489_v49  ;;  %s608_s30 = smov [#allocation2]  }
   0x7   :  { %499 = vmatpush3.bf16.msra.mxu0 %v645_v6  ;;  %v138_v10 = vsub.s32 1, %v35_v9  ;;  %v36_v11 = vsub.s32 0, %v35_v9  ;;  %v237_v23 = vsub.s32 2, %v35_v9  ;;  %v336_v39 = vsub.s32 3, %v35_v9  ;;  %s447_s5 = sshll.u32 %s608_s30, 4  ;;  %s448_s5 = int_to_ptr.vmem [resolvable:$true] %s447_s5 }
   0x8   :  { %510 = vmatprep.subr.bf16.mxu0 %v604_v7  ;;  %v486_v58 = vunpack.c.h.bf16 %v489_v49  ;;  %vm606_vm9 = vmmov 0   ;;  %vm439_vm10 = vcmask 261120   ;;  %s577_s6 = scalar_lea.vmem %s448_s5, 256  ;;  %p582_p1 = scmp.lt.s32.totalorder %s448_s5, %s448_s5 }
   0x9   :  { %v139_v15 = vrot.slane %v23_v12, %v138_v10  ;;  %v37_v16 = vrot.slane %v23_v12, %v36_v11  ;;  %v238_v34 = vrot.slane %v23_v12, %v237_v23  ;;  %v337_v52 = vrot.slane %v23_v12, %v336_v39  ;;  %500 = vmatprep.mubr.msk.bf16.mxu0 %vm606_vm9, %v604_v7  ;;  %p578_p0 = scmp.ne.s32.totalorder %s448_s5, %s577_s6  ;;  %p583_p2 = scmp.lt.s32.totalorder %s577_s6, %s577_s6 }
   0xa   :  { %537 = vset.pattern.permute.xlu1 %v601_v4  ;;  %536 = vset.pattern.permute.xlu0 %v601_v4 }
   0xb   :  { %232 = vperm.xlu1 %537, %v22_v3   ;;  %228 = vperm.xlu0 %536, %v21_v0   ;;  %p584_p3 = por %p583_p2, %p582_p1 }
   0xc   :  { %506 = vmatprep.mubr.msk.bf16.mxu1 %vm606_vm9, %v604_v7 }
   0xd   :  { %p585_p4 = pnand %p584_p3, %p578_p0 }
   0xf   :  { %538 = vset.pattern.permute.xlu1 %v602_v5  ;;  %539 = vset.pattern.permute.xlu0 %v602_v5 }
  0x10   :  { %327 = vperm.xlu1 %538, %v21_v0   ;;  %331 = vperm.xlu0 %539, %v22_v3  }
  0x14   :  { %174 = vrot.lane.b32.xlu1 %v645_v6, %s603_s21 }
  0x7d   :  { %v130_v19 = vpop.permute.xlu1 %129  ;;  %v27_v20 = vpop.permute.xlu0 %26 }
  0x7e   :  { %v140_v21 = vadd.f32 %v139_v15, %v130_v19  ;;  %v38_v22 = vadd.f32 %v37_v16, %v27_v20 }
  0x80   :  { %v147_v24 = vadd.f32 %v477_v17, %v140_v21  ;;  %v44_v25 = vadd.f32 %v473_v18, %v38_v22 }
  0x81   :  { %v134_v28 = vpop.permute.xlu1 %133  ;;  %v32_v29 = vpop.permute.xlu0 %31 }
  0x82   :  { %v141_v30 = vadd.f32 %v139_v15, %v134_v28  ;;  %v39_v31 = vadd.f32 %v37_v16, %v32_v29  ;;  %vm46_vm1 = vcmp.gt.f32.partialorder %v44_v25, 0.0  ;;  %v48_v33 = vmul.f32 0.2, %v44_v25 }
  0x83   :  { %vm149_vm2 = vcmp.gt.f32.partialorder %v147_v24, 0.0  ;;  %v151_v35 = vmul.f32 0.2, %v147_v24 }
  0x84   :  { %v148_v36 = vadd.f32 %v478_v26, %v141_v30  ;;  %v45_v37 = vadd.f32 %v474_v27, %v39_v31  ;;  %v664_v38 = vsel %vm46_vm1, %v44_v25, %v48_v33 }
  0x85   :  { %v53_v42 = vsel %vm52_vm0, %v664_v38, -inf  ;;  %v668_v46 = vsel %vm149_vm2, %v147_v24, %v151_v35 }
  0x86   :  { %v233_v43 = vpop.permute.xlu1 %232  ;;  %v229_v44 = vpop.permute.xlu0 %228  ;;  %54 = vmax.xlane.f32.xlu1 %v53_v42  ;;  %vm47_vm3 = vcmp.gt.f32.partialorder %v45_v37, 0.0  ;;  %v49_v45 = vmul.f32 0.2, %v45_v37  ;;  %vm150_vm4 = vcmp.gt.f32.partialorder %v148_v36, 0.0  ;;  %v152_v50 = vmul.f32 0.2, %v148_v36 }
  0x87   :  { %v240_v47 = vadd.f32 %v238_v34, %v233_v43  ;;  %v239_v48 = vadd.f32 %v238_v34, %v229_v44  ;;  %v155_v56 = vsel %vm52_vm0, %v668_v46, -inf }
  0x88   :  { %v51_v51 = vsel %vm47_vm3, %v45_v37, %v49_v45  ;;  %v154_v59 = vsel %vm150_vm4, %v148_v36, %v152_v50 }
  0x89   :  { %v247_v53 = vadd.f32 %v482_v40, %v240_v47  ;;  %v246_v54 = vadd.f32 %v481_v41, %v239_v48  ;;  %v56_v55 = vsel %vm52_vm0, %v51_v51, -inf  ;;  %v158_v2 = vsel %vm52_vm0, %v154_v59, -inf }
  0x8a   :  { %57 = vmax.xlane.f32.xlu0 %v56_v55  ;;  %156 = vmax.xlane.f32.xlu1 %v155_v56 }
  0x8b   :  { %v328_v60 = vpop.permute.xlu1 %327  ;;  %v332_v61 = vpop.permute.xlu0 %331  ;;  %vm248_vm5 = vcmp.gt.f32.partialorder %v246_v54, 0.0  ;;  %v250_v62 = vmul.f32 0.2, %v246_v54  ;;  %vm249_vm6 = vcmp.gt.f32.partialorder %v247_v53, 0.0  ;;  %v251_v63 = vmul.f32 0.2, %v247_v53 }
  0x8c   :  { %v338_v0 = vadd.f32 %v337_v52, %v328_v60  ;;  %v339_v1 = vadd.f32 %v337_v52, %v332_v61 }
  0x8d   :  { %v252_v3 = vsel %vm248_vm5, %v246_v54, %v250_v62  ;;  %v253_v9 = vsel %vm249_vm6, %v247_v53, %v251_v63 }
  0x8e   :  { %v345_v4 = vadd.f32 %v485_v57, %v338_v0  ;;  %v346_v5 = vadd.f32 %v486_v58, %v339_v1  ;;  %159 = vmax.xlane.f32.xlu0 %v158_v2  ;;  %v254_v8 = vsel %vm52_vm0, %v252_v3, -inf  ;;  %v257_v13 = vsel %vm52_vm0, %v253_v9, -inf }
  0x8f   :  { %255 = vmax.xlane.f32.xlu1 %v254_v8  ;;  %v175_v10 = vpop.permute.xlu1 %174 }
  0x90   :  { %vm347_vm7 = vcmp.gt.f32.partialorder %v345_v4, 0.0  ;;  %v349_v11 = vmul.f32 0.2, %v345_v4  ;;  %vm348_vm8 = vcmp.gt.f32.partialorder %v346_v5, 0.0  ;;  %v350_v12 = vmul.f32 0.2, %v346_v5  ;;  %505 = vmatpush3.bf16.msra.mxu1 %v175_v10 }
  0x91   :  { %516 = vmatprep.subr.bf16.mxu1 %v604_v7 }
  0x92   :  { %258 = vmax.xlane.f32.xlu0 %v257_v13  ;;  %v351_v14 = vsel %vm347_vm7, %v345_v4, %v349_v11  ;;  %v352_v15 = vsel %vm348_vm8, %v346_v5, %v350_v12 }
  0x93   :  { %v353_v16 = vsel %vm52_vm0, %v351_v14, -inf  ;;  %v356_v17 = vsel %vm52_vm0, %v352_v15, -inf }
  0x94   :  { %354 = vmax.xlane.f32.xlu1 %v353_v16 }
  0x96   :  { %357 = vmax.xlane.f32.xlu0 %v356_v17 }
  0xa5   :  { %372 = vrot.lane.b32.xlu1 %v645_v6, %s605_s3 }
  0xac   :  { %273 = vrot.lane.b32.xlu0 %v645_v6, %s607_s29 }
 0x10f   :  { %v55_v18 = vpop.xlane.xlu1 %54 }
 0x110   :  { %v59_v19 = vsub.f32 %v664_v38, %v55_v18 }
 0x112   :  { %v61_v20 = vmul.f32 1.442695, %v59_v19 }
 0x113   :  { %v58_v21 = vpop.xlane.xlu0 %57  ;;  %v157_v22 = vpop.xlane.xlu1 %156 }
 0x114   :  { %541 = vpow2.f32 %v61_v20  ;;  %v60_v23 = vsub.f32 %v51_v51, %v58_v21  ;;  %v161_v24 = vsub.f32 %v668_v46, %v157_v22 }
 0x116   :  { %v63_v25 = vmul.f32 1.442695, %v60_v23  ;;  %v163_v26 = vmul.f32 1.442695, %v161_v24 }
 0x117   :  { %v160_v27 = vpop.xlane.xlu0 %159 }
 0x118   :  { %543 = vpow2.f32 %v63_v25  ;;  %v162_v28 = vsub.f32 %v154_v59, %v160_v27  ;;  %v256_v29 = vpop.xlane.xlu1 %255 }
 0x119   :  { %v260_v30 = vsub.f32 %v252_v3, %v256_v29  ;;  %545 = vpow2.f32 %v163_v26 }
 0x11a   :  { %v165_v31 = vmul.f32 1.442695, %v162_v28 }
 0x11b   :  { %v262_v6 = vmul.f32 1.442695, %v260_v30  ;;  %v259_v32 = vpop.xlane.xlu0 %258 }
 0x11c   :  { %547 = vpow2.f32 %v165_v31  ;;  %v261_v33 = vsub.f32 %v253_v9, %v259_v32 }
 0x11d   :  { %v355_v34 = vpop.xlane.xlu1 %354  ;;  %549 = vpow2.f32 %v262_v6 }
 0x11e   :  { %v264_v35 = vmul.f32 1.442695, %v261_v33  ;;  %v359_v36 = vsub.f32 %v351_v14, %v355_v34 }
 0x11f   :  { %v358_v37 = vpop.xlane.xlu0 %357 }
 0x120   :  { %551 = vpow2.f32 %v264_v35  ;;  %v361_v38 = vmul.f32 1.442695, %v359_v36  ;;  %v360_v39 = vsub.f32 %v352_v15, %v358_v37 }
 0x121   :  { %v542_v40 = vpop.eup %541  ;;  %v373_v51 = vpop.permute.xlu1 %372 }
 0x122   :  { %553 = vpow2.f32 %v361_v38  ;;  %v363_v41 = vmul.f32 1.442695, %v360_v39  ;;  %v65_v42 = vsel %vm52_vm0, %v542_v40, 0.0 }
 0x123   :  { %66 = vadd.xlane.f32.xlu1 %v65_v42  ;;  %v274_v46 = vpop.permute.xlu0 %273 }
 0x124   :  { %555 = vpow2.f32 %v363_v41 }
 0x125   :  { %v544_v43 = vpop.eup %543 }
 0x126   :  { %v68_v44 = vsel %vm52_vm0, %v544_v43, 0.0  ;;  %v71_v45 = vpack.c.bf16 %v544_v43, %v542_v40  ;;  %v546_v47 = vpop.eup %545 }
 0x127   :  { %69 = vadd.xlane.f32.xlu0 %v68_v44  ;;  %v167_v50 = vsel %vm52_vm0, %v546_v47, 0.0 }
 0x128   :  { %501 = vmatmul.mubr.msk.bf16.vlgmr.msra.gmra.mxu0 %vm52_vm0, %v71_v45 }
 0x129   :  { %v548_v48 = vpop.eup %547  ;;  %511 = vmatpush3.bf16.msra.mxu0 %v274_v46  ;;  %512 = vmatprep.mubr.msk.bf16.mxu0 %vm606_vm9, %v604_v7 }
 0x12a   :  { %v170_v49 = vsel %vm52_vm0, %v548_v48, 0.0  ;;  %v173_v52 = vpack.c.bf16 %v548_v48, %v546_v47  ;;  %v550_v53 = vpop.eup %549 }
 0x12b   :  { %171 = vadd.xlane.f32.xlu1 %v170_v49  ;;  %168 = vadd.xlane.f32.xlu0 %v167_v50  ;;  %v266_v56 = vsel %vm52_vm0, %v550_v53, 0.0 }
 0x12c   :  { %507 = vmatmul.mubr.msk.bf16.vlgmr.msra.gmra.mxu1 %vm52_vm0, %v173_v52 }
 0x12d   :  { %v552_v54 = vpop.eup %551  ;;  %517 = vmatpush3.bf16.msra.mxu1 %v373_v51  ;;  %518 = vmatprep.mubr.msk.bf16.mxu1 %vm606_vm9, %v604_v7 }
 0x12e   :  { %v269_v55 = vsel %vm52_vm0, %v552_v54, 0.0  ;;  %v272_v57 = vpack.c.bf16 %v552_v54, %v550_v53 }
 0x12f   :  { %v554_v58 = vpop.eup %553  ;;  %270 = vadd.xlane.f32.xlu1 %v269_v55  ;;  %267 = vadd.xlane.f32.xlu0 %v266_v56 }
 0x130   :  { %513 = vmatmul.mubr.msk.bf16.vlgmr.msra.gmra.mxu0 %vm52_vm0, %v272_v57  ;;  %v365_v61 = vsel %vm52_vm0, %v554_v58, 0.0 }
 0x131   :  { %v556_v59 = vpop.eup %555 }
 0x132   :  { %v368_v60 = vsel %vm52_vm0, %v556_v59, 0.0  ;;  %v371_v62 = vpack.c.bf16 %v556_v59, %v554_v58 }
 0x133   :  { %369 = vadd.xlane.f32.xlu1 %v368_v60  ;;  %366 = vadd.xlane.f32.xlu0 %v365_v61 }
 0x134   :  { %519 = vmatmul.mubr.msk.bf16.vlgmr.msra.gmra.mxu1 %vm52_vm0, %v371_v62 }
 0x1ac   :  { %v67_v63 = vpop.xlane.xlu1 %66 }
 0x1b0   :  { %v70_v7 = vpop.xlane.xlu0 %69 }
 0x1b4   :  { %v169_v0 = vpop.xlane.xlu0 %168  ;;  %v172_v1 = vpop.xlane.xlu1 %171 }
 0x1b5   :  { %557 = vrcp.f32 %v169_v0 }
 0x1b6   :  { %559 = vrcp.f32 %v67_v63 }
 0x1b8   :  { %v268_v2 = vpop.xlane.xlu0 %267  ;;  %v271_v3 = vpop.xlane.xlu1 %270 }
 0x1b9   :  { %561 = vrcp.f32 %v268_v2 }
 0x1ba   :  { %563 = vrcp.f32 %v70_v7 }
 0x1bb   :  { %565 = vrcp.f32 %v172_v1 }
 0x1bc   :  { %v367_v4 = vpop.xlane.xlu0 %366  ;;  %567 = vrcp.f32 %v271_v3  ;;  %v370_v5 = vpop.xlane.xlu1 %369 }
 0x1bd   :  { %569 = vrcp.f32 %v367_v4 }
 0x1be   :  { %571 = vrcp.f32 %v370_v5 }
 0x1c2   :  { %v558_v12 = vpop.eup %557 }
 0x1c3   :  { %v560_v15 = vpop.eup %559 }
 0x1c6   :  { %v562_v17 = vpop.eup %561 }
 0x1c7   :  { %v564_v20 = vpop.eup %563 }
 0x1c8   :  { %v566_v23 = vpop.eup %565 }
 0x1c9   :  { %v568_v26 = vpop.eup %567 }
 0x1ca   :  { %v570_v29 = vpop.eup %569 }
 0x1cb   :  { %v572_v39 = vpop.eup %571 }
 0x1e8   :  { %v115_v8 = vpop.f32.mrf.mxu0 }
 0x1e9   :  { %v124_v21 = vmul.f32 %v560_v15, %v115_v8 }
 0x1ea   :  { %v502_v9 = vpop.f32.mrf.mxu0 }
 0x1ec   :  { %v118_v10 = vpop.f32.mrf.mxu0  ;;  %v214_v11 = vpop.f32.mrf.mxu1 }
 0x1ed   :  { %v223_v16 = vmul.f32 %v558_v12, %v214_v11  ;;  %v125_v6 = vmul.f32 %v564_v20, %v118_v10 }
 0x1ee   :  { %v503_v13 = vpop.f32.mrf.mxu0  ;;  %v508_v14 = vpop.f32.mrf.mxu1 }
 0x1ef   :  { %v225_v27 = vadd.f32 %v223_v16, %v124_v21 }
 0x1f0   :  { %v217_v18 = vpop.f32.mrf.mxu1  ;;  %v313_v19 = vpop.f32.mrf.mxu0 }
 0x1f1   :  { %v322_v22 = vmul.f32 %v562_v17, %v313_v19  ;;  %v224_v28 = vmul.f32 %v566_v23, %v217_v18 }
 0x1f2   :  { %v509_v24 = vpop.f32.mrf.mxu1  ;;  %v514_v25 = vpop.f32.mrf.mxu0 }
 0x1f3   :  { %v324_v32 = vadd.f32 %v322_v22, %v225_v27  ;;  %v226_v37 = vadd.f32 %v224_v28, %v125_v6 }
 0x1f4   :  { %v316_v30 = vpop.f32.mrf.mxu0  ;;  %v412_v31 = vpop.f32.mrf.mxu1 }
 0x1f5   :  { %v323_v33 = vmul.f32 %v568_v26, %v316_v30  ;;  %v421_v34 = vmul.f32 %v570_v29, %v412_v31 }
 0x1f6   :  { %v515_v35 = vpop.f32.mrf.mxu0  ;;  %v520_v36 = vpop.f32.mrf.mxu1 }
 0x1f7   :  { %v423_v38 = vadd.f32 %v421_v34, %v324_v32  ;;  %v325_v41 = vadd.f32 %v323_v33, %v226_v37 }
 0x1f8   :  { %v415_v40 = vpop.f32.mrf.mxu1 }
 0x1f9   :  { %v425_v42 = vmul.f32 0.25, %v423_v38  ;;  %v422_v43 = vmul.f32 %v572_v39, %v415_v40 }
 0x1fa   :  { %v521_v44 = vpop.f32.mrf.mxu1 }
 0x1fb   :  { %v429_v45 = vmin.f32 %v425_v42, 0.0  ;;  %v424_v46 = vadd.f32 %v422_v43, %v325_v41  ;;  %vm427_vm11 = vcmp.gt.f32.partialorder %v425_v42, 0.0 }
 0x1fd   :  { %v431_v47 = vmul.f32 1.442695, %v429_v45  ;;  %v426_v48 = vmul.f32 0.25, %v424_v46 }
 0x1ff   :  { %573 = vpow2.f32 %v431_v47  ;;  %v430_v49 = vmin.f32 %v426_v48, 0.0  ;;  %vm428_vm12 = vcmp.gt.f32.partialorder %v426_v48, 0.0 }
 0x201   :  { %v433_v50 = vmul.f32 1.442695, %v430_v49 }
 0x203   :  { %575 = vpow2.f32 %v433_v50 }
 0x20c   :  { %v574_v51 = vpop.eup %573 }
 0x20d   :  { %v469_v52 = vadd.f32 -1.0, %v574_v51 }
 0x20f   :  { %v437_v53 = vsel %vm427_vm11, %v425_v42, %v469_v52 }
 0x210   :  { %v576_v54 = vpop.eup %575  ;;  %440 = vst.msk [vmem:[#allocation2] sm:$0xff] %vm439_vm10, %v437_v53 }
 0x211   :  { %v470_v55 = vadd.f32 -1.0, %v576_v54 }
 0x213   :  { %v438_v56 = vsel %vm428_vm12, %v426_v48, %v470_v55 }
 0x214   :  { %441 = vst.msk [vmem:[#allocation2 + $0x8] sm:$0xff] %vm439_vm10, %v438_v56 }
 0x215   :  { %588 = shalt.err (!%p585_p4)
}
 0x216   :  { %s609_s7 = smov 128   ;;  %s610_s8 = smov 8  }
 0x217   :  { %453 = dma.vmem_to_hbm [thread:$0]  %s448_s5, 256, %s713_s4, [#allocation3], %s609_s7, %s609_s7, %s610_s8  }
 0x218   :  { %597 = dma.done.wait [#allocation3], 256  }
 0x219   :  { %598 = vsyncadd [#allocation3], 4294967040 }
 0x21a   :  { %457 = vsyncpa [#allocation3], 1 }

</bundles_post_ra>
